<compile_context>
chip_gen: v7x
topology: tpu7x:2x2x1
jax: 0.10.0
libtpu: 0.0.40
codegen_flags: <defaults>
</compile_context>

<pallas_src>
import jax
import jax.numpy as jnp
from jax.experimental import pallas as pl
from jax.experimental.pallas import tpu as pltpu


# Below this particle count we fully unroll the K accumulation (static
# indices, tiny (TB, H) temporaries).  Above it, fall back to the vectorized
# multiply+reduce to avoid excessive unrolled code.
_UNROLL_K_LIMIT = 128


def _aggregate_kernel(p_ref, w_ref, o_ref):
    # p_ref: (TB, K, H)   w_ref: (TB, K)   o_ref: (TB, H)
    num_particles = w_ref.shape[-1]
    tb, h = o_ref.shape

    # Numerically-stable softmax statistics over the particle axis,
    # computed once per batch tile.
    w = w_ref[...].astype(jnp.float32)                      # (TB, K) log-weights
    m = jnp.max(w, axis=-1, keepdims=True)                  # (TB, 1)
    e = jnp.exp(w - m)                                      # (TB, K) unnormalized
    z = jnp.sum(e, axis=-1, keepdims=True)                  # (TB, 1)

    if num_particles <= _UNROLL_K_LIMIT:
        # Accumulate over particles with small (TB, H) temporaries instead of
        # materializing a (TB, K, H) f32 product (keeps vreg/VMEM pressure low).
        acc = jnp.zeros((tb, h), jnp.float32)
        for k in range(num_particles):                      # K is static -> unrolled
            acc = acc + e[:, k:k + 1] * p_ref[:, k, :].astype(jnp.float32)
    else:
        # Fallback for very large particle counts.
        p = p_ref[...].astype(jnp.float32)                  # (TB, K, H)
        acc = jnp.sum(p * e[:, :, None], axis=1)            # (TB, H)

    # Fold the softmax normalizer into the output (one reciprocal per output
    # row); the approximate reciprocal runs on the EUP slot.
    inv_z = pl.reciprocal(z, approx=True)                   # (TB, 1)
    o_ref[...] = (acc * inv_z).astype(o_ref.dtype)


def _choose_batch_tile(batch, num_particles, h_dim, itemsize, vmem_budget_bytes):
    """Pick a batch tile so the dominant (TB, K, H) particles tile stays under
    `vmem_budget_bytes` (double-buffering doubles the resident footprint)."""
    row_bytes = max(1, num_particles * h_dim * itemsize)
    tb = max(1, vmem_budget_bytes // row_bytes)
    if tb >= batch:
        return batch                       # whole batch fits in one tile
    tb = max(8, (tb // 8) * 8)             # keep block rows sublane-aligned
    return min(tb, batch)


def aggregate(particles, weight, *, batch_tile=None, vmem_budget_bytes=4 << 20):
    """Softmax(weight)-weighted mean of particles over the particle axis.

    particles: (B, K, H) float (f32 or bf16; math is done in f32 in-kernel)
    weight:    (B, K)   float log-weights
    returns:   (B, H)   in particles.dtype
    """
    B, K, H = particles.shape
    assert weight.shape == (B, K), (weight.shape, (B, K))

    itemsize = jnp.dtype(particles.dtype).itemsize
    tb = batch_tile if batch_tile is not None else _choose_batch_tile(
        B, K, H, itemsize, vmem_budget_bytes)
    grid = (pl.cdiv(B, tb),)

    return pl.pallas_call(
        _aggregate_kernel,
        out_shape=jax.ShapeDtypeStruct((B, H), particles.dtype),
        grid_spec=pltpu.PrefetchScalarGridSpec(
            num_scalar_prefetch=0,
            grid=grid,
            in_specs=[
                pl.BlockSpec((tb, K, H), lambda i: (i, 0, 0)),
                pl.BlockSpec((tb, K), lambda i: (i, 0)),
            ],
            out_specs=pl.BlockSpec((tb, H), lambda i: (i, 0)),
        ),
        compiler_params=pltpu.CompilerParams(
            dimension_semantics=("parallel",),
        ),
    )(particles, weight)


def aggregate_ref(particles, weight):
    nw = jax.nn.softmax(weight.astype(jnp.float32), axis=-1)
    out = jnp.sum(particles.astype(jnp.float32) * nw[:, :, None], axis=1)
    return out.astype(particles.dtype)


if __name__ == "__main__":
    # Module hyper-params (shapes implied by the constructor):
    batch = 2
    num_particles = 16
    num_features = 4        # only used by the MGF variant; unused here
    h_dim = 32
    obs_encode_dim = 8      # not used by the aggregation itself

    key = jax.random.PRNGKey(0)
    kp, kw = jax.random.split(key)
    particles = jax.random.normal(kp, (batch, num_particles, h_dim), dtype=jnp.float32)
    weight = jax.random.normal(kw, (batch, num_particles), dtype=jnp.float32)

    out = aggregate(particles, weight)
    jax.block_until_ready(out)
    ref = aggregate_ref(particles, weight)
    assert out.shape == (batch, h_dim)
    # Tolerance accounts for the EUP approximate reciprocal.
    assert jnp.allclose(out, ref, atol=2e-3, rtol=2e-3)

    # Second check exercising a multi-step (pipelined) grid over the batch.
    kp2, kw2 = jax.random.split(jax.random.PRNGKey(0), 2)
    B2 = 64
    particles2 = jax.random.normal(kp2, (B2, num_particles, h_dim), dtype=jnp.float32)
    weight2 = jax.random.normal(kw2, (B2, num_particles), dtype=jnp.float32)
    out2 = aggregate(particles2, weight2, batch_tile=16)   # grid = (4,)
    jax.block_until_ready(out2)
    ref2 = aggregate_ref(particles2, weight2)
    assert out2.shape == (B2, h_dim)
    assert jnp.allclose(out2, ref2, atol=2e-3, rtol=2e-3)

    print("KERNEL_OK")
</pallas_src>

<mosaic_0001>
module attributes {stable_mosaic.version = 11 : i64} {
  func.func @_aggregate_kernel(%arg0: i32, %arg1: memref<2x16x32xf32, #tpu.memory_space<vmem>>, %arg2: memref<2x16xf32, #tpu.memory_space<vmem>>, %arg3: memref<2x32xf32, #tpu.memory_space<vmem>>) attributes {dimension_semantics = [#tpu.dimension_semantics<parallel>], iteration_bounds = array<i64: 1>, scalar_prefetch = 0 : i64, scratch_operands = 0 : i64, tpu.core_type = #tpu.core_type<tc>, window_params = [{transform_indices = @transform_0, window_bounds = array<i64: 2, 16, 32>}, {transform_indices = @transform_1, window_bounds = array<i64: 2, 16>}, {transform_indices = @transform_2, window_bounds = array<i64: 2, 32>}]} {
    %c0 = arith.constant 0 : index
    %c0_0 = arith.constant 0 : index
    %0 = vector.load %arg2[%c0, %c0_0] : memref<2x16xf32, #tpu.memory_space<vmem>>, vector<2x16xf32>
    %cst = arith.constant dense<0xFF800000> : vector<2xf32>
    %1 = vector.multi_reduction <maximumf>, %0, %cst [1] : vector<2x16xf32> to vector<2xf32>
    %2 = vector.shape_cast %1 : vector<2xf32> to vector<2x1xf32>
    %3 = vector.broadcast %2 : vector<2x1xf32> to vector<2x16xf32>
    %4 = arith.subf %0, %3 : vector<2x16xf32>
    %5 = math.exp %4 : vector<2x16xf32>
    %cst_1 = arith.constant dense<0.000000e+00> : vector<2xf32>
    %6 = vector.multi_reduction <add>, %5, %cst_1 [1] : vector<2x16xf32> to vector<2xf32>
    %7 = vector.shape_cast %6 : vector<2xf32> to vector<2x1xf32>
    %cst_2 = arith.constant 0.000000e+00 : f32
    %8 = vector.broadcast %cst_2 : f32 to vector<2x32xf32>
    %9 = vector.extract_strided_slice %5 {offsets = [0, 0], sizes = [2, 1], strides = [1, 1]} : vector<2x16xf32> to vector<2x1xf32>
    %c0_3 = arith.constant 0 : index
    %c0_4 = arith.constant 0 : index
    %c0_5 = arith.constant 0 : index
    %10 = vector.load %arg1[%c0_3, %c0_4, %c0_5] : memref<2x16x32xf32, #tpu.memory_space<vmem>>, vector<2x1x32xf32>
    %11 = vector.shape_cast %10 : vector<2x1x32xf32> to vector<2x32xf32>
    %12 = vector.broadcast %9 : vector<2x1xf32> to vector<2x32xf32>
    %13 = arith.mulf %12, %11 : vector<2x32xf32>
    %14 = arith.addf %8, %13 : vector<2x32xf32>
    %15 = vector.extract_strided_slice %5 {offsets = [0, 1], sizes = [2, 1], strides = [1, 1]} : vector<2x16xf32> to vector<2x1xf32>
    %c0_6 = arith.constant 0 : index
    %c1 = arith.constant 1 : index
    %c0_7 = arith.constant 0 : index
    %16 = vector.load %arg1[%c0_6, %c1, %c0_7] : memref<2x16x32xf32, #tpu.memory_space<vmem>>, vector<2x1x32xf32>
    %17 = vector.shape_cast %16 : vector<2x1x32xf32> to vector<2x32xf32>
    %18 = vector.broadcast %15 : vector<2x1xf32> to vector<2x32xf32>
    %19 = arith.mulf %18, %17 : vector<2x32xf32>
    %20 = arith.addf %14, %19 : vector<2x32xf32>
    %21 = vector.extract_strided_slice %5 {offsets = [0, 2], sizes = [2, 1], strides = [1, 1]} : vector<2x16xf32> to vector<2x1xf32>
    %c0_8 = arith.constant 0 : index
    %c2 = arith.constant 2 : index
    %c0_9 = arith.constant 0 : index
    %22 = vector.load %arg1[%c0_8, %c2, %c0_9] : memref<2x16x32xf32, #tpu.memory_space<vmem>>, vector<2x1x32xf32>
    %23 = vector.shape_cast %22 : vector<2x1x32xf32> to vector<2x32xf32>
    %24 = vector.broadcast %21 : vector<2x1xf32> to vector<2x32xf32>
    %25 = arith.mulf %24, %23 : vector<2x32xf32>
    %26 = arith.addf %20, %25 : vector<2x32xf32>
    %27 = vector.extract_strided_slice %5 {offsets = [0, 3], sizes = [2, 1], strides = [1, 1]} : vector<2x16xf32> to vector<2x1xf32>
    %c0_10 = arith.constant 0 : index
    %c3 = arith.constant 3 : index
    %c0_11 = arith.constant 0 : index
    %28 = vector.load %arg1[%c0_10, %c3, %c0_11] : memref<2x16x32xf32, #tpu.memory_space<vmem>>, vector<2x1x32xf32>
    %29 = vector.shape_cast %28 : vector<2x1x32xf32> to vector<2x32xf32>
    %30 = vector.broadcast %27 : vector<2x1xf32> to vector<2x32xf32>
    %31 = arith.mulf %30, %29 : vector<2x32xf32>
    %32 = arith.addf %26, %31 : vector<2x32xf32>
    %33 = vector.extract_strided_slice %5 {offsets = [0, 4], sizes = [2, 1], strides = [1, 1]} : vector<2x16xf32> to vector<2x1xf32>
    %c0_12 = arith.constant 0 : index
    %c4 = arith.constant 4 : index
    %c0_13 = arith.constant 0 : index
    %34 = vector.load %arg1[%c0_12, %c4, %c0_13] : memref<2x16x32xf32, #tpu.memory_space<vmem>>, vector<2x1x32xf32>
    %35 = vector.shape_cast %34 : vector<2x1x32xf32> to vector<2x32xf32>
    %36 = vector.broadcast %33 : vector<2x1xf32> to vector<2x32xf32>
    %37 = arith.mulf %36, %35 : vector<2x32xf32>
    %38 = arith.addf %32, %37 : vector<2x32xf32>
    %39 = vector.extract_strided_slice %5 {offsets = [0, 5], sizes = [2, 1], strides = [1, 1]} : vector<2x16xf32> to vector<2x1xf32>
    %c0_14 = arith.constant 0 : index
    %c5 = arith.constant 5 : index
    %c0_15 = arith.constant 0 : index
    %40 = vector.load %arg1[%c0_14, %c5, %c0_15] : memref<2x16x32xf32, #tpu.memory_space<vmem>>, vector<2x1x32xf32>
    %41 = vector.shape_cast %40 : vector<2x1x32xf32> to vector<2x32xf32>
    %42 = vector.broadcast %39 : vector<2x1xf32> to vector<2x32xf32>
    %43 = arith.mulf %42, %41 : vector<2x32xf32>
    %44 = arith.addf %38, %43 : vector<2x32xf32>
    %45 = vector.extract_strided_slice %5 {offsets = [0, 6], sizes = [2, 1], strides = [1, 1]} : vector<2x16xf32> to vector<2x1xf32>
    %c0_16 = arith.constant 0 : index
    %c6 = arith.constant 6 : index
    %c0_17 = arith.constant 0 : index
    %46 = vector.load %arg1[%c0_16, %c6, %c0_17] : memref<2x16x32xf32, #tpu.memory_space<vmem>>, vector<2x1x32xf32>
    %47 = vector.shape_cast %46 : vector<2x1x32xf32> to vector<2x32xf32>
    %48 = vector.broadcast %45 : vector<2x1xf32> to vector<2x32xf32>
    %49 = arith.mulf %48, %47 : vector<2x32xf32>
    %50 = arith.addf %44, %49 : vector<2x32xf32>
    %51 = vector.extract_strided_slice %5 {offsets = [0, 7], sizes = [2, 1], strides = [1, 1]} : vector<2x16xf32> to vector<2x1xf32>
    %c0_18 = arith.constant 0 : index
    %c7 = arith.constant 7 : index
    %c0_19 = arith.constant 0 : index
    %52 = vector.load %arg1[%c0_18, %c7, %c0_19] : memref<2x16x32xf32, #tpu.memory_space<vmem>>, vector<2x1x32xf32>
    %53 = vector.shape_cast %52 : vector<2x1x32xf32> to vector<2x32xf32>
    %54 = vector.broadcast %51 : vector<2x1xf32> to vector<2x32xf32>
    %55 = arith.mulf %54, %53 : vector<2x32xf32>
    %56 = arith.addf %50, %55 : vector<2x32xf32>
    %57 = vector.extract_strided_slice %5 {offsets = [0, 8], sizes = [2, 1], strides = [1, 1]} : vector<2x16xf32> to vector<2x1xf32>
    %c0_20 = arith.constant 0 : index
    %c8 = arith.constant 8 : index
    %c0_21 = arith.constant 0 : index
    %58 = vector.load %arg1[%c0_20, %c8, %c0_21] : memref<2x16x32xf32, #tpu.memory_space<vmem>>, vector<2x1x32xf32>
    %59 = vector.shape_cast %58 : vector<2x1x32xf32> to vector<2x32xf32>
    %60 = vector.broadcast %57 : vector<2x1xf32> to vector<2x32xf32>
    %61 = arith.mulf %60, %59 : vector<2x32xf32>
    %62 = arith.addf %56, %61 : vector<2x32xf32>
    %63 = vector.extract_strided_slice %5 {offsets = [0, 9], sizes = [2, 1], strides = [1, 1]} : vector<2x16xf32> to vector<2x1xf32>
    %c0_22 = arith.constant 0 : index
    %c9 = arith.constant 9 : index
    %c0_23 = arith.constant 0 : index
    %64 = vector.load %arg1[%c0_22, %c9, %c0_23] : memref<2x16x32xf32, #tpu.memory_space<vmem>>, vector<2x1x32xf32>
    %65 = vector.shape_cast %64 : vector<2x1x32xf32> to vector<2x32xf32>
    %66 = vector.broadcast %63 : vector<2x1xf32> to vector<2x32xf32>
    %67 = arith.mulf %66, %65 : vector<2x32xf32>
    %68 = arith.addf %62, %67 : vector<2x32xf32>
    %69 = vector.extract_strided_slice %5 {offsets = [0, 10], sizes = [2, 1], strides = [1, 1]} : vector<2x16xf32> to vector<2x1xf32>
    %c0_24 = arith.constant 0 : index
    %c10 = arith.constant 10 : index
    %c0_25 = arith.constant 0 : index
    %70 = vector.load %arg1[%c0_24, %c10, %c0_25] : memref<2x16x32xf32, #tpu.memory_space<vmem>>, vector<2x1x32xf32>
    %71 = vector.shape_cast %70 : vector<2x1x32xf32> to vector<2x32xf32>
    %72 = vector.broadcast %69 : vector<2x1xf32> to vector<2x32xf32>
    %73 = arith.mulf %72, %71 : vector<2x32xf32>
    %74 = arith.addf %68, %73 : vector<2x32xf32>
    %75 = vector.extract_strided_slice %5 {offsets = [0, 11], sizes = [2, 1], strides = [1, 1]} : vector<2x16xf32> to vector<2x1xf32>
    %c0_26 = arith.constant 0 : index
    %c11 = arith.constant 11 : index
    %c0_27 = arith.constant 0 : index
    %76 = vector.load %arg1[%c0_26, %c11, %c0_27] : memref<2x16x32xf32, #tpu.memory_space<vmem>>, vector<2x1x32xf32>
    %77 = vector.shape_cast %76 : vector<2x1x32xf32> to vector<2x32xf32>
    %78 = vector.broadcast %75 : vector<2x1xf32> to vector<2x32xf32>
    %79 = arith.mulf %78, %77 : vector<2x32xf32>
    %80 = arith.addf %74, %79 : vector<2x32xf32>
    %81 = vector.extract_strided_slice %5 {offsets = [0, 12], sizes = [2, 1], strides = [1, 1]} : vector<2x16xf32> to vector<2x1xf32>
    %c0_28 = arith.constant 0 : index
    %c12 = arith.constant 12 : index
    %c0_29 = arith.constant 0 : index
    %82 = vector.load %arg1[%c0_28, %c12, %c0_29] : memref<2x16x32xf32, #tpu.memory_space<vmem>>, vector<2x1x32xf32>
    %83 = vector.shape_cast %82 : vector<2x1x32xf32> to vector<2x32xf32>
    %84 = vector.broadcast %81 : vector<2x1xf32> to vector<2x32xf32>
    %85 = arith.mulf %84, %83 : vector<2x32xf32>
    %86 = arith.addf %80, %85 : vector<2x32xf32>
    %87 = vector.extract_strided_slice %5 {offsets = [0, 13], sizes = [2, 1], strides = [1, 1]} : vector<2x16xf32> to vector<2x1xf32>
    %c0_30 = arith.constant 0 : index
    %c13 = arith.constant 13 : index
    %c0_31 = arith.constant 0 : index
    %88 = vector.load %arg1[%c0_30, %c13, %c0_31] : memref<2x16x32xf32, #tpu.memory_space<vmem>>, vector<2x1x32xf32>
    %89 = vector.shape_cast %88 : vector<2x1x32xf32> to vector<2x32xf32>
    %90 = vector.broadcast %87 : vector<2x1xf32> to vector<2x32xf32>
    %91 = arith.mulf %90, %89 : vector<2x32xf32>
    %92 = arith.addf %86, %91 : vector<2x32xf32>
    %93 = vector.extract_strided_slice %5 {offsets = [0, 14], sizes = [2, 1], strides = [1, 1]} : vector<2x16xf32> to vector<2x1xf32>
    %c0_32 = arith.constant 0 : index
    %c14 = arith.constant 14 : index
    %c0_33 = arith.constant 0 : index
    %94 = vector.load %arg1[%c0_32, %c14, %c0_33] : memref<2x16x32xf32, #tpu.memory_space<vmem>>, vector<2x1x32xf32>
    %95 = vector.shape_cast %94 : vector<2x1x32xf32> to vector<2x32xf32>
    %96 = vector.broadcast %93 : vector<2x1xf32> to vector<2x32xf32>
    %97 = arith.mulf %96, %95 : vector<2x32xf32>
    %98 = arith.addf %92, %97 : vector<2x32xf32>
    %99 = vector.extract_strided_slice %5 {offsets = [0, 15], sizes = [2, 1], strides = [1, 1]} : vector<2x16xf32> to vector<2x1xf32>
    %c0_34 = arith.constant 0 : index
    %c15 = arith.constant 15 : index
    %c0_35 = arith.constant 0 : index
    %100 = vector.load %arg1[%c0_34, %c15, %c0_35] : memref<2x16x32xf32, #tpu.memory_space<vmem>>, vector<2x1x32xf32>
    %101 = vector.shape_cast %100 : vector<2x1x32xf32> to vector<2x32xf32>
    %102 = vector.broadcast %99 : vector<2x1xf32> to vector<2x32xf32>
    %103 = arith.mulf %102, %101 : vector<2x32xf32>
    %104 = arith.addf %98, %103 : vector<2x32xf32>
    %105 = tpu.reciprocal %7 {approx = true} : vector<2x1xf32> -> vector<2x1xf32>
    %106 = vector.broadcast %105 : vector<2x1xf32> to vector<2x32xf32>
    %107 = arith.mulf %104, %106 : vector<2x32xf32>
    %c0_36 = arith.constant 0 : index
    %c0_37 = arith.constant 0 : index
    %108 = vector.load %arg3[%c0_36, %c0_37] : memref<2x32xf32, #tpu.memory_space<vmem>>, vector<2x32xf32>
    tpu.vector_store %arg3[%c0_36, %c0_37], %107 {strides = array<i32>} : memref<2x32xf32, #tpu.memory_space<vmem>>, vector<2x32xf32>,
    return
  }
  func.func @transform_0(%arg0: i32) -> (i32, i32, i32) {
    %c0_i32 = arith.constant 0 : i32
    %c0_i32_0 = arith.constant 0 : i32
    %c0_i32_1 = arith.constant 0 : i32
    return %arg0, %c0_i32, %c0_i32_0 : i32, i32, i32
  }
  func.func @transform_1(%arg0: i32) -> (i32, i32) {
    %c0_i32 = arith.constant 0 : i32
    %c0_i32_0 = arith.constant 0 : i32
    return %arg0, %c0_i32 : i32, i32
  }
  func.func @transform_2(%arg0: i32) -> (i32, i32) {
    %c0_i32 = arith.constant 0 : i32
    %c0_i32_0 = arith.constant 0 : i32
    return %arg0, %c0_i32 : i32, i32
  }
}

</mosaic_0001>

<bundles_post_ra>
// kernel: tpu_custom_call.1
= control target key start
LH: loop header
LB: loop body
LE: loop exit
PB: predicated region body
PF: predicated region fallthrough
CT: control target
= control target key end

     0   :  { %7 = vsyncpa [#allocation3], 0  ;;  %s435_s0 = inlined_call_operand.hbm [shape: f32[2,16,32], index: 0, kind: input, shape index: {}]   ;;  %s436_s1 = inlined_call_operand.vmem [shape: f32[2,16], index: 1, kind: input, shape index: {}]   ;;  %s437_s2 = inlined_call_operand.hbm [shape: f32[2,32], index: 2, kind: output, shape index: {}]  }
   0x1   :  { %8 = vsyncpa [#allocation4], 0  ;;  %s355_s9 = smov [#allocation2]   ;;  %s307_s13 = scalar_lea.hbm %s435_s0, 512 }
   0x2   :  { %s14_s10 = sshll.u32 %s355_s9, 4  ;;  %p308_p0 = scmp.ne.s32.totalorder %s435_s0, %s307_s13  ;;  %s15_s10 = int_to_ptr.vmem [resolvable:$true] %s14_s10 }
   0x3   :  { %p311_p1 = scmp.lt.u32.totalorder %s307_s13, %s435_s0 }
   0x5   :  { %p313_p2 = pnand %p311_p1, %p308_p0 }
   0x7   :  { %316 = shalt.err (!%p313_p2)
}
   0x8   :  { %s317_s18 = scalar_lea.vmem %s15_s10, 512  ;;  %p322_p4 = scmp.lt.s32.totalorder %s15_s10, %s15_s10 }
   0x9   :  { %p318_p3 = scmp.ne.s32.totalorder %s15_s10, %s317_s18  ;;  %p323_p5 = scmp.lt.s32.totalorder %s317_s18, %s317_s18 }
   0xb   :  { %p324_p6 = por %p323_p5, %p322_p4 }
   0xd   :  { %p325_p7 = pnand %p324_p6, %p318_p3 }
   0xf   :  { %328 = shalt.err (!%p325_p7)
}
  0x10   :  { %s356_s19 = smov 128   ;;  %s357_s20 = smov 8  }
  0x11   :  { %20 = dma.hbm_to_vmem [thread:$0]  %s435_s0, 512, %s15_s10, [#allocation3], %s356_s19, %s356_s19, %s357_s20  }
  0x12   :  { %351 = dma.done.wait [#allocation3], 512  }
  0x13   :  { %352 = vsyncadd [#allocation3], 4294966784  ;;  %vm27_vm0 = vcmask 123904   ;;  %v26_v0 = vld [vmem:[%s436_s1] sm:$0x3]  ;;  %v358_v2 = vmov 1  }
  0x14   :  { %v28_v1 = vsel %vm27_vm0, %v26_v0, -inf  ;;  %287 = vset.pattern.permute.xlu1 %v358_v2  ;;  %v359_v3 = vmov 0   ;;  %v360_v8 = vmov 2   ;;  %v361_v9 = vmov 8   ;;  %v53_v26 = vld [vmem:[#allocation2 + $0x11] sm:$0x1] }
  0x15   :  { %29 = vmax.xlane.f32.xlu0 %v28_v1  ;;  %v362_v10 = vmov 3   ;;  %v363_v11 = vmov 9   ;;  %v364_v12 = vmov 4   ;;  %v365_v13 = vmov 10   ;;  %v38_v27 = vld [vmem:[#allocation2 + $0x10] sm:$0x1] }
  0x16   :  { %286 = vset.pattern.permute.xlu0 %v359_v3  ;;  %v366_v14 = vmov 5   ;;  %v367_v15 = vmov 12   ;;  %v368_v16 = vmov 6   ;;  %v369_v17 = vmov 13   ;;  %v66_v29 = vld [vmem:[#allocation2 + $0x12] sm:$0x1] }
  0x17   :  { %v370_v18 = vmov 7   ;;  %v371_v19 = vmov 15   ;;  %v372_v20 = vmov 11   ;;  %v373_v21 = vmov 14   ;;  %v52_v32 = vld [vmem:[#allocation2 + $0x1] sm:$0x1] }
  0x18   :  { %vm47_vm1 = vcmask 1041409   ;;  %v60_v30 = vrot.slane %v53_v26, 7  ;;  %v46_v31 = vrot.slane %v38_v27, 7  ;;  %v37_v33 = vld [vmem:[#allocation2] sm:$0x1]  ;;  %v73_v35 = vrot.slane %v66_v29, 7 }
  0x19   :  { %v79_v34 = vld [vmem:[#allocation2 + $0x13] sm:$0x1]  ;;  %v65_v36 = vld [vmem:[#allocation2 + $0x2] sm:$0x1]  ;;  %v92_v37 = vld [vmem:[#allocation2 + $0x14] sm:$0x1] }
  0x1a   :  { %v61_v38 = vsel %vm47_vm1, %v60_v30, %v52_v32  ;;  %v48_v39 = vsel %vm47_vm1, %v46_v31, %v37_v33  ;;  %v86_v41 = vrot.slane %v79_v34, 7  ;;  %v78_v43 = vld [vmem:[#allocation2 + $0x3] sm:$0x1]  ;;  %v105_v44 = vld [vmem:[#allocation2 + $0x15] sm:$0x1]  ;;  %v74_v45 = vsel %vm47_vm1, %v73_v35, %v65_v36  ;;  %s374_s0 = smov [#allocation5]  }
  0x1b   :  { %v99_v46 = vrot.slane %v92_v37, 7  ;;  %v91_v49 = vld [vmem:[#allocation2 + $0x4] sm:$0x1]  ;;  %v118_v50 = vld [vmem:[#allocation2 + $0x16] sm:$0x1]  ;;  %v112_v52 = vrot.slane %v105_v44, 7 }
  0x1c   :  { %v87_v51 = vsel %vm47_vm1, %v86_v41, %v78_v43  ;;  %v104_v54 = vld [vmem:[#allocation2 + $0x5] sm:$0x1]  ;;  %v131_v55 = vld [vmem:[#allocation2 + $0x17] sm:$0x1]  ;;  %v125_v57 = vrot.slane %v118_v50, 7  ;;  %s257_s1 = sshll.u32 %s374_s0, 4  ;;  %s258_s1 = int_to_ptr.vmem [resolvable:$true] %s257_s1 }
  0x1d   :  { %v100_v56 = vsel %vm47_vm1, %v99_v46, %v91_v49  ;;  %v117_v61 = vld [vmem:[#allocation2 + $0x6] sm:$0x1]  ;;  %v113_v62 = vsel %vm47_vm1, %v112_v52, %v104_v54  ;;  %v138_v63 = vrot.slane %v131_v55, 7  ;;  %v130_v2 = vld [vmem:[#allocation2 + $0x7] sm:$0x1]  ;;  %vm249_vm2 = vcmask 254976   ;;  %p334_p9 = scmp.lt.s32.totalorder %s258_s1, %s258_s1 }
  0x1e   :  { %v126_v3 = vsel %vm47_vm1, %v125_v57, %v117_v61  ;;  %v169_v27 = vld [vmem:[#allocation2 + $0xa] sm:$0x1]  ;;  %v183_v29 = vld [vmem:[#allocation2 + $0x1b] sm:$0x1]  ;;  %v196_v34 = vld [vmem:[#allocation2 + $0x1c] sm:$0x1] }
  0x1f   :  { %v190_v33 = vrot.slane %v183_v29, 7  ;;  %v182_v35 = vld [vmem:[#allocation2 + $0xb] sm:$0x1]  ;;  %v195_v41 = vld [vmem:[#allocation2 + $0xc] sm:$0x1]  ;;  %s329_s25 = scalar_lea.vmem %s258_s1, 32 }
  0x20   :  { %v222_v50 = vld [vmem:[#allocation2 + $0x1e] sm:$0x1]  ;;  %v235_v52 = vld [vmem:[#allocation2 + $0x1f] sm:$0x1]  ;;  %v234_v61 = vld [vmem:[#allocation2 + $0xf] sm:$0x1]  ;;  %p330_p8 = scmp.ne.s32.totalorder %s258_s1, %s329_s25  ;;  %p335_p10 = scmp.lt.s32.totalorder %s329_s25, %s329_s25 }
  0x21   :  { %v242_v57 = vrot.slane %v235_v52, 7 }
  0x22   :  { %p336_p11 = por %p335_p10, %p334_p9 }
  0x24   :  { %p337_p12 = pnand %p336_p11, %p330_p8 }
  0xa2   :  { %v30_v4 = vpop.xlane.xlu0 %29 }
  0xa3   :  { %v31_v5 = vsub.f32 %v26_v0, %v30_v4  ;;  %v144_v4 = vld [vmem:[#allocation2 + $0x18] sm:$0x1] }
  0xa5   :  { %v32_v6 = vmul.f32 1.442695, %v31_v5 }
  0xa7   :  { %303 = vpow2.f32 %v32_v6 }
  0xb1   :  { %v304_v7 = vpop.eup %303 }
  0xb2   :  { %55 = vperm.xlu1 %287, %v304_v7   ;;  %41 = vperm.xlu0 %286, %v304_v7   ;;  %v34_v22 = vsel %vm27_vm0, %v304_v7, 0.0 }
  0xb6   :  { %288 = vset.pattern.permute.xlu1 %v360_v8  ;;  %294 = vset.pattern.permute.xlu0 %v361_v9 }
  0xb7   :  { %68 = vperm.xlu1 %288, %v304_v7   ;;  %146 = vperm.xlu0 %294, %v304_v7  }
  0xbb   :  { %289 = vset.pattern.permute.xlu1 %v362_v10  ;;  %295 = vset.pattern.permute.xlu0 %v363_v11  ;;  %v151_v11 = vrot.slane %v144_v4, 7 }
  0xbc   :  { %81 = vperm.xlu1 %289, %v304_v7   ;;  %159 = vperm.xlu0 %295, %v304_v7  }
  0xc0   :  { %290 = vset.pattern.permute.xlu1 %v364_v12  ;;  %296 = vset.pattern.permute.xlu0 %v365_v13  ;;  %v143_v13 = vld [vmem:[#allocation2 + $0x8] sm:$0x1] }
  0xc1   :  { %94 = vperm.xlu1 %290, %v304_v7   ;;  %172 = vperm.xlu0 %296, %v304_v7  }
  0xc5   :  { %291 = vset.pattern.permute.xlu1 %v366_v14  ;;  %298 = vset.pattern.permute.xlu0 %v367_v15  ;;  %v157_v14 = vld [vmem:[#allocation2 + $0x19] sm:$0x1] }
  0xc6   :  { %107 = vperm.xlu1 %291, %v304_v7   ;;  %198 = vperm.xlu0 %298, %v304_v7  }
  0xca   :  { %292 = vset.pattern.permute.xlu1 %v368_v16  ;;  %299 = vset.pattern.permute.xlu0 %v369_v17 }
  0xcb   :  { %120 = vperm.xlu1 %292, %v304_v7   ;;  %211 = vperm.xlu0 %299, %v304_v7  }
  0xcf   :  { %293 = vset.pattern.permute.xlu1 %v370_v18  ;;  %302 = vset.pattern.permute.xlu0 %v371_v19  ;;  %v152_v18 = vsel %vm47_vm1, %v151_v11, %v143_v13 }
  0xd0   :  { %133 = vperm.xlu1 %293, %v304_v7  }
  0xd4   :  { %297 = vset.pattern.permute.xlu1 %v372_v20  ;;  %v156_v20 = vld [vmem:[#allocation2 + $0x9] sm:$0x1] }
  0xd5   :  { %185 = vperm.xlu1 %297, %v304_v7  }
  0xd9   :  { %300 = vset.pattern.permute.xlu1 %v373_v21  ;;  %v170_v21 = vld [vmem:[#allocation2 + $0x1a] sm:$0x1] }
  0xda   :  { %224 = vperm.xlu1 %300, %v304_v7   ;;  %v177_v26 = vrot.slane %v170_v21, 7 }
  0xdc   :  { %v178_v31 = vsel %vm47_vm1, %v177_v26, %v169_v27 }
  0xde   :  { %301 = vset.pattern.permute.xlu1 %v371_v19  ;;  %v164_v19 = vrot.slane %v157_v14, 7 }
  0xfe   :  { %35 = vadd.xlane.f32.xlu1 %v34_v22 }
 0x10f   :  { %237 = vperm.xlu1 %301, %v304_v7   ;;  %v139_v7 = vsel %vm47_vm1, %v138_v63, %v130_v2 }
 0x131   :  { %v56_v23 = vpop.permute.xlu1 %55  ;;  %v42_v40 = vpop.permute.xlu0 %41 }
 0x132   :  { %v63_v47 = vmul.f32 %v61_v38, %v56_v23  ;;  %v50_v48 = vmul.f32 %v48_v39, %v42_v40  ;;  %v203_v39 = vrot.slane %v196_v34, 7  ;;  %v191_v40 = vsel %vm47_vm1, %v190_v33, %v182_v35 }
 0x134   :  { %v64_v59 = vadd.f32 %v63_v47, %v50_v48  ;;  %v204_v46 = vsel %vm47_vm1, %v203_v39, %v195_v41  ;;  %v208_v48 = vld [vmem:[#allocation2 + $0xd] sm:$0x1] }
 0x136   :  { %v69_v24 = vpop.permute.xlu1 %68  ;;  %v147_v12 = vpop.permute.xlu0 %146 }
 0x137   :  { %v76_v53 = vmul.f32 %v74_v45, %v69_v24  ;;  %v154_v24 = vmul.f32 %v152_v18, %v147_v12 }
 0x139   :  { %v77_v0 = vadd.f32 %v76_v53, %v64_v59  ;;  %v221_v59 = vld [vmem:[#allocation2 + $0xe] sm:$0x1] }
 0x13b   :  { %v82_v25 = vpop.permute.xlu1 %81  ;;  %v160_v23 = vpop.permute.xlu0 %159 }
 0x13c   :  { %v89_v60 = vmul.f32 %v87_v51, %v82_v25  ;;  %v165_v25 = vsel %vm47_vm1, %v164_v19, %v156_v20 }
 0x13d   :  { %v167_v30 = vmul.f32 %v165_v25, %v160_v23 }
 0x13e   :  { %v90_v5 = vadd.f32 %v89_v60, %v77_v0  ;;  %v243_v0 = vsel %vm47_vm1, %v242_v57, %v234_v61 }
 0x140   :  { %v95_v28 = vpop.permute.xlu1 %94  ;;  %v173_v32 = vpop.permute.xlu0 %172 }
 0x141   :  { %v102_v1 = vmul.f32 %v100_v56, %v95_v28  ;;  %v180_v37 = vmul.f32 %v178_v31, %v173_v32  ;;  %v229_v56 = vrot.slane %v222_v50, 7 }
 0x143   :  { %v103_v9 = vadd.f32 %v102_v1, %v90_v5  ;;  %v230_v63 = vsel %vm47_vm1, %v229_v56, %v221_v59 }
 0x145   :  { %v108_v42 = vpop.permute.xlu1 %107  ;;  %v199_v44 = vpop.permute.xlu0 %198 }
 0x146   :  { %v115_v6 = vmul.f32 %v113_v62, %v108_v42  ;;  %v209_v42 = vld [vmem:[#allocation2 + $0x1d] sm:$0x1]  ;;  %v206_v53 = vmul.f32 %v204_v46, %v199_v44 }
 0x147   :  { %v216_v47 = vrot.slane %v209_v42, 7 }
 0x148   :  { %v116_v15 = vadd.f32 %v115_v6, %v103_v9 }
 0x149   :  { %v217_v54 = vsel %vm47_vm1, %v216_v47, %v208_v48 }
 0x14a   :  { %v121_v58 = vpop.permute.xlu1 %120  ;;  %v212_v55 = vpop.permute.xlu0 %211 }
 0x14b   :  { %v128_v10 = vmul.f32 %v126_v3, %v121_v58  ;;  %v219_v62 = vmul.f32 %v217_v54, %v212_v55 }
 0x14d   :  { %v129_v17 = vadd.f32 %v128_v10, %v116_v15 }
 0x14f   :  { %v134_v8 = vpop.permute.xlu1 %133 }
 0x150   :  { %v141_v16 = vmul.f32 %v139_v7, %v134_v8 }
 0x152   :  { %v142_v22 = vadd.f32 %v141_v16, %v129_v17 }
 0x154   :  { %v155_v28 = vadd.f32 %v154_v24, %v142_v22  ;;  %v186_v38 = vpop.permute.xlu1 %185 }
 0x155   :  { %v193_v45 = vmul.f32 %v191_v40, %v186_v38 }
 0x156   :  { %v168_v36 = vadd.f32 %v167_v30, %v155_v28 }
 0x158   :  { %v181_v43 = vadd.f32 %v180_v37, %v168_v36 }
 0x159   :  { %v225_v51 = vpop.permute.xlu1 %224 }
 0x15a   :  { %v194_v49 = vadd.f32 %v193_v45, %v181_v43  ;;  %v232_v3 = vmul.f32 %v230_v63, %v225_v51 }
 0x15c   :  { %v207_v58 = vadd.f32 %v206_v53, %v194_v49 }
 0x15e   :  { %v220_v1 = vadd.f32 %v219_v62, %v207_v58 }
 0x160   :  { %v233_v5 = vadd.f32 %v232_v3, %v220_v1 }
 0x18b   :  { %v36_v60 = vpop.xlane.xlu1 %35 }
 0x18c   :  { %305 = vrcp.f32 %v36_v60 }
 0x18f   :  { %v238_v2 = vpop.permute.xlu1 %237 }
 0x190   :  { %v245_v4 = vmul.f32 %v243_v0, %v238_v2 }
 0x192   :  { %v246_v6 = vadd.f32 %v245_v4, %v233_v5 }
 0x196   :  { %v306_v7 = vpop.eup %305 }
 0x197   :  { %v248_v8 = vmul.f32 %v306_v7, %v246_v6 }
 0x199   :  { %250 = vst.msk [vmem:[#allocation5] sm:$0x3] %vm249_vm2, %v248_v8 }
 0x19a   :  { %340 = shalt.err (!%p337_p12)
}
 0x19b   :  { %s341_s28 = scalar_lea.hbm %s437_s2, 32 }
 0x19c   :  { %p342_p13 = scmp.ne.s32.totalorder %s437_s2, %s341_s28  ;;  %p345_p0 = scmp.lt.u32.totalorder %s341_s28, %s437_s2 }
 0x19e   :  { %p347_p1 = pnand %p345_p0, %p342_p13 }
 0x1a0   :  { %350 = shalt.err (!%p347_p1)
}
 0x1a1   :  { %260 = dma.vmem_to_hbm [thread:$0]  %s258_s1, 32, %s437_s2, [#allocation4]  }
 0x1a2   :  { %353 = dma.done.wait [#allocation4], 32  }
 0x1a3   :  { %354 = vsyncadd [#allocation4], 4294967264 }
 0x1a4   :  { %264 = vsyncpa [#allocation3], 1 }
 0x1a5   :  { %265 = vsyncpa [#allocation4], 1 }

</bundles_post_ra>
